<compile_context>
chip_gen: v6e
topology: v6e:2x2x1
jax: 0.10.0
libtpu: 0.0.40
codegen_flags: <defaults>
</compile_context>

<pallas_src>
import functools

import jax
import jax.numpy as jnp
from jax.experimental import pallas as pl
from jax.experimental.pallas import tpu as pltpu


def _heatmap_kernel(cols_ref, rows_ref, out_ref, *,
                    neg_inv_heatmap_size: float, convex: bool):
    # cols_ref: (tile_rows, 2)  per-output-row constants
    # rows_ref: (2, l_tile)     per-output-lane constants
    # out_ref : (tile_rows, l_tile)
    c_a = cols_ref[:, 0:1]                     # (tile_rows, 1)
    c_b = cols_ref[:, 1:2]                     # (tile_rows, 1)
    r_a = rows_ref[0:1, :]                     # (1, l_tile)
    r_b = rows_ref[1:2, :]                     # (1, l_tile)
    d_a = r_a - c_a                            # (tile_rows, l_tile) via broadcast
    d_b = r_b - c_b
    sq = d_a * d_a + d_b * d_b
    # Sign folded into the constant (saves a VALU negate; exp goes to EUP).
    heat = jnp.exp(sq * neg_inv_heatmap_size)
    if not convex:
        heat = jnp.abs(1.0 - heat)
    out_ref[...] = heat.astype(out_ref.dtype)


def _position_lines(width: int, height: int, normalized: bool):
    # Matches create_position_encoding: pos_x varies along the last axis
    # (length = height), pos_y along the first axis (length = width).
    if normalized:
        x_lin = jnp.linspace(0.0, 1.0, height, dtype=jnp.float32)
        y_lin = jnp.linspace(0.0, 1.0, width, dtype=jnp.float32)
    else:
        x_lin = jnp.linspace(0.0, float(height - 1), height, dtype=jnp.float32)
        y_lin = jnp.linspace(0.0, float(width - 1), width, dtype=jnp.float32)
    return x_lin, y_lin


def _round_up(x: int, m: int) -> int:
    return ((x + m - 1) // m) * m


def _block_budget_bytes() -> int:
    """Per-pipeline-buffer VMEM budget (doubled by double-buffering)."""
    try:
        vmem = int(pltpu.get_tpu_info().vmem_capacity_bytes)
    except Exception:
        vmem = 64 << 20
    if vmem >= (128 << 20):     # v5e / v6e: big blocks amortize ~0.35us/step
        return 12 << 20
    return 6 << 20              # v7x: 64 MiB physical / 32 MiB scoped


def _choose_tiles(n_rows: int, n_lanes: int, itemsize: int, budget: int):
    """Pick (tile_rows, l_tile) accounting for padded (8,128) VMEM tiles."""
    lpad = lambda n: _round_up(n, 128)

    # 1) Lane tile: full lanes if an 8-row block (+ its cols/rows side blocks)
    #    fits the budget, otherwise the largest fitting multiple of 128.
    def cost8(lanes):
        return 8 * lpad(lanes) * (itemsize + 4) + 8 * 128 * 4
    if n_lanes <= 128 or cost8(n_lanes) <= budget:
        l_tile = n_lanes
    else:
        l_tile = ((budget - 8 * 128 * 4) // (8 * (itemsize + 4))) // 128 * 128
        l_tile = min(max(128, l_tile), n_lanes)

    # 2) Row tile: as many 8-row groups as fit next to the (2, l_tile) rows block.
    fixed = 8 * lpad(l_tile) * 4                    # rows block (sublane-padded)
    per_row = lpad(l_tile) * itemsize + 128 * 4     # out row + cols row (lane-padded)
    max_rows = max(8, ((budget - fixed) // per_row) // 8 * 8)
    tile_rows = n_rows if n_rows <= max_rows else max_rows

    # 3) Force >= 2 grid steps for non-tiny outputs (dual-TC sharding on v7x).
    if (tile_rows == n_rows and l_tile == n_lanes
            and n_rows * n_lanes * itemsize > (256 << 10)):
        if n_rows >= 16:
            tile_rows = _round_up(pl.cdiv(n_rows, 2), 8)
        elif n_lanes >= 256:
            l_tile = _round_up(pl.cdiv(n_lanes, 2), 128)
    return tile_rows, l_tile


def inverse_spatial_softmax(keys, *, width: int, height: int,
                            heatmap_size: float = 0.1,
                            normalized: bool = True,
                            convex: bool = True,
                            out_dtype=jnp.float32):
    """keys: (B, C, 2) float32 -> heatmap (B, C, width, height) in out_dtype.

    out_dtype=jnp.bfloat16 is the fast path (kernel is HBM-write bound);
    squared-distance math stays in f32 and only the store is cast.
    """
    B, C, two = keys.shape
    assert two == 2, "keys must have shape (B, C, 2)"
    BC = B * C
    W, H = int(width), int(height)
    WH = W * H
    itemsize = jnp.dtype(out_dtype).itemsize

    keys_f = keys.reshape(BC, 2).astype(jnp.float32)
    x_lin, y_lin = _position_lines(W, H, normalized)

    if WH % 128 == 0:
        # Slab A: (BC, W*H) -- fully lane-dense output.
        n_rows, n_lanes = BC, WH
        cols = keys_f                                             # (BC, 2)
        pos_x = jnp.broadcast_to(x_lin[None, :], (W, H)).reshape(WH)
        pos_y = jnp.broadcast_to(y_lin[:, None], (W, H)).reshape(WH)
        rows = jnp.stack([pos_x, pos_y], axis=0)                  # (2, WH)
    else:
        # Slab B: (BC*W, H) -- full trailing H; no padded lanes reach HBM,
        # final reshape stays metadata-only (no repack copy).
        n_rows, n_lanes = BC * W, H
        col_a = jnp.broadcast_to(keys_f[:, 0][:, None], (BC, W))  # kx per (bc, w)
        col_b = keys_f[:, 1][:, None] - y_lin[None, :]            # ky - pos_y(w)
        cols = jnp.stack([col_a, col_b], axis=-1).reshape(BC * W, 2)
        rows = jnp.stack([x_lin, jnp.zeros_like(x_lin)], axis=0)  # (2, H)

    budget = _block_budget_bytes()
    tile_rows, l_tile = _choose_tiles(n_rows, n_lanes, itemsize, budget)
    grid = (pl.cdiv(n_rows, tile_rows), pl.cdiv(n_lanes, l_tile))

    kernel = functools.partial(
        _heatmap_kernel,
        neg_inv_heatmap_size=-1.0 / float(heatmap_size),
        convex=bool(convex))

    out_slab = pl.pallas_call(
        kernel,
        out_shape=jax.ShapeDtypeStruct((n_rows, n_lanes), out_dtype),
        grid_spec=pl.GridSpec(
            grid=grid,
            in_specs=[
                pl.BlockSpec((tile_rows, 2), lambda i, j: (i, 0)),   # per-row consts
                pl.BlockSpec((2, l_tile), lambda i, j: (0, j)),      # per-lane consts
            ],
            out_specs=pl.BlockSpec((tile_rows, l_tile), lambda i, j: (i, j)),
        ),
        compiler_params=pltpu.CompilerParams(
            dimension_semantics=("parallel", "parallel"),
            vmem_limit_bytes=32 * 1024 * 1024,
        ),
    )(cols, rows)

    # Metadata-only split of the leading dim(s): (BC, WH) or (BC*W, H) -> (B, C, W, H).
    return out_slab.reshape(B, C, W, H)


def _reference(keys, *, width, height, heatmap_size, normalized, convex):
    x_lin, y_lin = _position_lines(width, height, normalized)
    pos_x = jnp.broadcast_to(x_lin[None, :], (width, height))
    pos_y = jnp.broadcast_to(y_lin[:, None], (width, height))
    pos_xy = jnp.stack([pos_x, pos_y], axis=0)                    # (2, W, H)
    sq = jnp.sum((pos_xy[None, None] - keys[:, :, :, None, None]) ** 2, axis=2)
    heat = jnp.exp(-sq / heatmap_size)
    if not convex:
        heat = jnp.abs(1.0 - heat)
    return heat


if __name__ == "__main__":
    B, C = 2, 4
    HEATMAP_SIZE = 0.1

    key = jax.random.PRNGKey(0)
    # keys (attention points) in [0, 1], matching normalized position encoding.
    keys = jax.random.uniform(key, (B, C, 2), dtype=jnp.float32)

    # Path A: W*H is a multiple of 128 (lane-dense flat slab).
    W, H = 16, 16
    out = inverse_spatial_softmax(keys, width=W, height=H,
                                  heatmap_size=HEATMAP_SIZE,
                                  normalized=True, convex=True)
    out = jax.block_until_ready(out)
    ref = _reference(keys, width=W, height=H, heatmap_size=HEATMAP_SIZE,
                     normalized=True, convex=True)
    assert out.shape == (B, C, W, H)
    assert jnp.allclose(out, ref, atol=1e-5, rtol=1e-5)

    # Non-convex branch.
    out_nc = inverse_spatial_softmax(keys, width=W, height=H,
                                     heatmap_size=HEATMAP_SIZE,
                                     normalized=True, convex=False)
    ref_nc = _reference(keys, width=W, height=H, heatmap_size=HEATMAP_SIZE,
                        normalized=True, convex=False)
    assert jnp.allclose(jax.block_until_ready(out_nc), ref_nc, atol=1e-5, rtol=1e-5)

    # Path B: W*H not a multiple of 128 (row-flattened slab, no repack copy).
    W2, H2 = 12, 12
    out_b = inverse_spatial_softmax(keys, width=W2, height=H2,
                                    heatmap_size=HEATMAP_SIZE,
                                    normalized=True, convex=True)
    ref_b = _reference(keys, width=W2, height=H2, heatmap_size=HEATMAP_SIZE,
                       normalized=True, convex=True)
    assert out_b.shape == (B, C, W2, H2)
    assert jnp.allclose(jax.block_until_ready(out_b), ref_b, atol=1e-5, rtol=1e-5)

    print("KERNEL_OK")
</pallas_src>

<mosaic_0001>
module attributes {stable_mosaic.version = 11 : i64} {
  func.func @_heatmap_kernel(%arg0: i32, %arg1: i32, %arg2: memref<8x2xf32, #tpu.memory_space<vmem>>, %arg3: memref<2x256xf32, #tpu.memory_space<vmem>>, %arg4: memref<8x256xf32, #tpu.memory_space<vmem>>) attributes {dimension_semantics = [#tpu.dimension_semantics<parallel>, #tpu.dimension_semantics<parallel>], iteration_bounds = array<i64: 1, 1>, scalar_prefetch = 0 : i64, scratch_operands = 0 : i64, tpu.core_type = #tpu.core_type<tc>, window_params = [{transform_indices = @transform_0, window_bounds = array<i64: 8, 2>}, {transform_indices = @transform_1, window_bounds = array<i64: 2, 256>}, {transform_indices = @transform_2, window_bounds = array<i64: 8, 256>}]} {
    %c0 = arith.constant 0 : index
    %c0_0 = arith.constant 0 : index
    %0 = vector.load %arg2[%c0, %c0_0] : memref<8x2xf32, #tpu.memory_space<vmem>>, vector<8x1xf32>
    %c0_1 = arith.constant 0 : index
    %c1 = arith.constant 1 : index
    %1 = vector.load %arg2[%c0_1, %c1] : memref<8x2xf32, #tpu.memory_space<vmem>>, vector<8x1xf32>
    %c0_2 = arith.constant 0 : index
    %c0_3 = arith.constant 0 : index
    %2 = vector.load %arg3[%c0_2, %c0_3] : memref<2x256xf32, #tpu.memory_space<vmem>>, vector<1x256xf32>
    %c1_4 = arith.constant 1 : index
    %c0_5 = arith.constant 0 : index
    %3 = vector.load %arg3[%c1_4, %c0_5] : memref<2x256xf32, #tpu.memory_space<vmem>>, vector<1x256xf32>
    %4 = vector.broadcast %2 : vector<1x256xf32> to vector<8x256xf32>
    %5 = vector.broadcast %0 : vector<8x1xf32> to vector<8x256xf32>
    %6 = arith.subf %4, %5 : vector<8x256xf32>
    %7 = vector.broadcast %3 : vector<1x256xf32> to vector<8x256xf32>
    %8 = vector.broadcast %1 : vector<8x1xf32> to vector<8x256xf32>
    %9 = arith.subf %7, %8 : vector<8x256xf32>
    %10 = arith.mulf %6, %6 : vector<8x256xf32>
    %11 = arith.mulf %9, %9 : vector<8x256xf32>
    %12 = arith.addf %10, %11 : vector<8x256xf32>
    %cst = arith.constant -1.000000e+01 : f32
    %13 = vector.broadcast %cst : f32 to vector<8x256xf32>
    %14 = arith.mulf %12, %13 : vector<8x256xf32>
    %15 = math.exp %14 : vector<8x256xf32>
    %c0_6 = arith.constant 0 : index
    %c0_7 = arith.constant 0 : index
    %16 = vector.load %arg4[%c0_6, %c0_7] : memref<8x256xf32, #tpu.memory_space<vmem>>, vector<8x256xf32>
    tpu.vector_store %arg4[%c0_6, %c0_7], %15 {strides = array<i32>} : memref<8x256xf32, #tpu.memory_space<vmem>>, vector<8x256xf32>,
    return
  }
  func.func @transform_0(%arg0: i32, %arg1: i32) -> (i32, i32) {
    %c0_i32 = arith.constant 0 : i32
    %c0_i32_0 = arith.constant 0 : i32
    return %arg0, %c0_i32 : i32, i32
  }
  func.func @transform_1(%arg0: i32, %arg1: i32) -> (i32, i32) {
    %c0_i32 = arith.constant 0 : i32
    %c0_i32_0 = arith.constant 0 : i32
    return %c0_i32, %arg1 : i32, i32
  }
  func.func @transform_2(%arg0: i32, %arg1: i32) -> (i32, i32) {
    %c0_i32 = arith.constant 0 : i32
    return %arg0, %arg1 : i32, i32
  }
}

</mosaic_0001>

<bundles_post_ra>
// kernel: tpu_custom_call.1
= control target key start
LH: loop header
LB: loop body
LE: loop exit
PB: predicated region body
PF: predicated region fallthrough
CT: control target
= control target key end

     0   :  { %v111_v1 = vmov 0   ;;  %s141_s0 = inlined_call_operand.vmem [shape: f32[8,2], index: 0, kind: input, shape index: {}]   ;;  %s142_s1 = inlined_call_operand.vmem [shape: f32[2,256], index: 1, kind: input, shape index: {}]   ;;  %s143_s2 = inlined_call_operand.hbm [shape: f32[8,256], index: 2, kind: output, shape index: {}]  }
   0x1   :  { %v12_v0 = vld [vmem:[%s141_s0] sm:$0xff]  ;;  %83 = vset.pattern.permute.xlu0 %v111_v1 }
   0x2   :  { %7 = vsyncpa [#allocation3], 0  ;;  %29 = vperm.xlu0 %83, %v12_v0   ;;  %v112_v2 = vmov 1   ;;  %v17_v3 = vlaneseq  ;;  %v13_v7 = vld [vmem:[%s142_s1] ss:$2 sm:$0x3] }
   0x3   :  { %v79_v8 = vld [vmem:[%s142_s1 + $0x1] ss:$2 sm:$0x3]  ;;  %s113_s0 = smov [#allocation2]  }
   0x4   :  { %v18_v4 = vshrl.u32 %v17_v3, 7  ;;  %s71_s1 = sshll.u32 %s113_s0, 4  ;;  %s72_s1 = int_to_ptr.vmem [resolvable:$true] %s71_s1 }
   0x5   :  { %s89_s15 = scalar_lea.vmem %s72_s1, 256  ;;  %p94_p1 = scmp.lt.s32.totalorder %s72_s1, %s72_s1 }
   0x6   :  { %84 = vset.pattern.permute.xlu0 %v112_v2  ;;  %v19_v5 = vsub.s32 0, %v18_v4  ;;  %v23_v6 = vsub.s32 1, %v18_v4  ;;  %p90_p0 = scmp.ne.s32.totalorder %s72_s1, %s89_s15  ;;  %p95_p2 = scmp.lt.s32.totalorder %s89_s15, %s89_s15 }
   0x7   :  { %46 = vperm.xlu0 %84, %v12_v0  }
   0x8   :  { %v20_v9 = vrot.slane %v13_v7, %v19_v5  ;;  %v24_v10 = vrot.slane %v13_v7, %v23_v6  ;;  %v38_v12 = vrot.slane %v79_v8, %v19_v5  ;;  %v42_v13 = vrot.slane %v79_v8, %v23_v6  ;;  %p96_p3 = por %p95_p2, %p94_p1 }
   0xa   :  { %p97_p4 = pnand %p96_p3, %p90_p0 }
  0x7d   :  { %v30_v11 = vpop.permute.xlu0 %29 }
  0x7e   :  { %v32_v14 = vsub.f32 %v20_v9, %v30_v11  ;;  %v33_v15 = vsub.f32 %v24_v10, %v30_v11 }
  0x80   :  { %v51_v19 = vmul.f32 %v32_v14, %v32_v14  ;;  %v52_v20 = vmul.f32 %v33_v15, %v33_v15 }
  0x82   :  { %v47_v16 = vpop.permute.xlu0 %46 }
  0x83   :  { %v49_v17 = vsub.f32 %v38_v12, %v47_v16  ;;  %v50_v18 = vsub.f32 %v42_v13, %v47_v16 }
  0x85   :  { %v53_v21 = vmul.f32 %v49_v17, %v49_v17  ;;  %v54_v22 = vmul.f32 %v50_v18, %v50_v18 }
  0x87   :  { %v55_v23 = vadd.f32 %v53_v21, %v51_v19  ;;  %v56_v24 = vadd.f32 %v54_v22, %v52_v20 }
  0x89   :  { %v57_v25 = vmul.f32 -10.0, %v55_v23  ;;  %v58_v26 = vmul.f32 -10.0, %v56_v24 }
  0x8b   :  { %v59_v27 = vmul.f32 1.442695, %v57_v25  ;;  %v61_v28 = vmul.f32 1.442695, %v58_v26 }
  0x8d   :  { %85 = vpow2.f32 %v59_v27 }
  0x8e   :  { %87 = vpow2.f32 %v61_v28 }
  0x9a   :  { %v86_v29 = vpop.eup %85 }
  0x9b   :  { %v88_v30 = vpop.eup %87  ;;  %63 = vst [vmem:[#allocation2] sm:$0xff] %v86_v29 }
  0x9c   :  { %64 = vst [vmem:[#allocation2 + $0x8] sm:$0xff] %v88_v30 }
  0x9d   :  { %100 = shalt.err (!%p97_p4)
}
  0x9e   :  { %74 = dma.vmem_to_hbm [thread:$0]  %s72_s1, 256, %s143_s2, [#allocation3]  }
  0x9f   :  { %109 = dma.done.wait [#allocation3], 256  }
  0xa0   :  { %110 = vsyncadd [#allocation3], 4294967040 }
  0xa1   :  { %78 = vsyncpa [#allocation3], 1 }

</bundles_post_ra>
